<compile_context>
chip_gen: v5e
topology: v5e:2x2
jax: 0.10.0
libtpu: 0.0.40
codegen_flags: <defaults>
</compile_context>

<pallas_src>
import math
import functools

import jax
import jax.numpy as jnp
from jax.experimental import pallas as pl
from jax.experimental.pallas import tpu as pltpu


# ----------------------------------------------------------------------------
# Fused projection: one activation read, N bias-free matmuls, N outputs.
# ----------------------------------------------------------------------------

def _proj_kernel(x_ref, *refs):
    """x_ref: (TM, D_in); refs = (w_0..w_{n-1}, o_0..o_{n-1})."""
    n = len(refs) // 2
    w_refs, o_refs = refs[:n], refs[n:]
    x = x_ref[...].astype(jnp.bfloat16)           # cast in VMEM; feed MXU in bf16
    for w_ref, o_ref in zip(w_refs, o_refs):
        o_ref[...] = jnp.dot(
            x, w_ref[...], preferred_element_type=jnp.float32
        ).astype(o_ref.dtype)


def _fused_proj(x2d, weights, *, out_dtype=jnp.bfloat16, tm_max=1024):
    """(M, D_in) @ (D_in, D_out_i) for each weight from ONE pallas_call.

    The activation tile is DMA'd once per grid step and reused for every
    weight; weights stay VMEM-resident via a constant index_map.  tm_max=1024
    targets v5e/v6e (128 MiB VMEM); use 512 (or single-buffered weights) when
    weights are large on v7x.  Partial last M-blocks rely on Pallas
    partial-block padding, which is safe because each output row depends only
    on its own input rows.
    """
    M, D_in = x2d.shape
    d_outs = [int(w.shape[1]) for w in weights]
    tm = M if M <= tm_max else tm_max
    grid = (pl.cdiv(M, tm),)

    in_specs = [pl.BlockSpec((tm, D_in), lambda i: (i, 0))]
    in_specs += [pl.BlockSpec((D_in, d), lambda i: (0, 0)) for d in d_outs]
    out_specs = tuple(pl.BlockSpec((tm, d), lambda i: (i, 0)) for d in d_outs)
    out_shape = tuple(jax.ShapeDtypeStruct((M, d), out_dtype) for d in d_outs)

    out_itemsize = jnp.dtype(out_dtype).itemsize
    cost = pl.CostEstimate(
        flops=2 * M * D_in * sum(d_outs),
        transcendentals=0,
        bytes_accessed=(M * D_in * x2d.dtype.itemsize
                        + sum(D_in * d * 2 for d in d_outs)        # bf16 weights
                        + sum(M * d * out_itemsize for d in d_outs)),
    )

    res = pl.pallas_call(
        _proj_kernel,
        out_shape=out_shape,
        grid_spec=pltpu.PrefetchScalarGridSpec(
            num_scalar_prefetch=0,
            grid=grid,
            in_specs=in_specs,
            out_specs=out_specs,
        ),
        compiler_params=pltpu.CompilerParams(
            dimension_semantics=("parallel",)),       # row-parallel -> megacore
        cost_estimate=cost,
    )(x2d, *(w.astype(jnp.bfloat16) for w in weights))
    if not isinstance(res, (list, tuple)):
        res = (res,)
    return tuple(res)


# ----------------------------------------------------------------------------
# Attention (unscaled dot-product, softmax) with head split/merge and the
# output projection w_o fused into a single kernel.  Grid is over batch only.
# ----------------------------------------------------------------------------

def _attn_kernel(q_ref, k_ref, v_ref, wo_ref, o_ref, acc_ref, *, num_heads):
    """q_ref: (1,Sq,H) bf16; k_ref/v_ref: (1,Sk,H) bf16; wo_ref: (H,H) bf16;
    o_ref: (1,Sq,H) out dtype; acc_ref: VMEM (Sq,H) f32 scratch.

    Heads are lane slices of the H axis, processed with a static unroll, so
    the HBM<->VMEM tiles stay lane-dense and all heads are handled per step.
    """
    H = q_ref.shape[2]
    dh = H // num_heads

    for h in range(num_heads):                       # static unroll, heads small
        lo = h * dh
        qh = q_ref[0, :, lo:lo + dh]                 # (Sq, dh) bf16
        kh = k_ref[0, :, lo:lo + dh]                 # (Sk, dh) bf16
        vh = v_ref[0, :, lo:lo + dh]                 # (Sk, dh) bf16

        # score = q @ k^T (unscaled, matching the reference module), f32 acc
        s = jax.lax.dot_general(
            qh, kh, (((1,), (1,)), ((), ())), preferred_element_type=jnp.float32)

        # numerically stable softmax over keys, f32; divide on the EUP slot
        m = jnp.max(s, axis=-1, keepdims=True)
        p = jnp.exp(s - m)
        inv = pl.reciprocal(jnp.sum(p, axis=-1, keepdims=True), approx=True)
        attn = (p * inv).astype(vh.dtype)            # bf16 probs for PV matmul

        acc_ref[:, lo:lo + dh] = jnp.dot(
            attn, vh, preferred_element_type=jnp.float32)

    # epilogue: merged heads (Sq, H) @ w_o (H, H), result written lane-dense
    o_ref[0] = jnp.dot(
        acc_ref[...].astype(wo_ref.dtype), wo_ref[...],
        preferred_element_type=jnp.float32
    ).astype(o_ref.dtype)


def _fused_attention(q, k, v, w_o, *, num_heads, out_dtype):
    """q: (B,Sq,H), k/v: (B,Sk,H) (bf16), w_o: (H,H) -> (B,Sq,H) out_dtype."""
    B, Sq, H = q.shape
    Sk = k.shape[1]
    w_o = w_o.astype(jnp.bfloat16)

    cost = pl.CostEstimate(
        flops=B * (4 * Sq * Sk * H + 2 * Sq * H * H),
        transcendentals=B * num_heads * Sq * Sk,
        bytes_accessed=((B * Sq * H + 2 * B * Sk * H) * q.dtype.itemsize
                        + H * H * 2
                        + B * Sq * H * jnp.dtype(out_dtype).itemsize),
    )

    return pl.pallas_call(
        functools.partial(_attn_kernel, num_heads=num_heads),
        out_shape=jax.ShapeDtypeStruct((B, Sq, H), out_dtype),
        grid_spec=pltpu.PrefetchScalarGridSpec(
            num_scalar_prefetch=0,
            grid=(B,),                                   # all heads per grid step
            in_specs=[
                pl.BlockSpec((1, Sq, H), lambda b: (b, 0, 0)),
                pl.BlockSpec((1, Sk, H), lambda b: (b, 0, 0)),
                pl.BlockSpec((1, Sk, H), lambda b: (b, 0, 0)),
                pl.BlockSpec((H, H), lambda b: (0, 0)),  # w_o stays VMEM-resident
            ],
            out_specs=pl.BlockSpec((1, Sq, H), lambda b: (b, 0, 0)),
            scratch_shapes=[pltpu.VMEM((Sq, H), jnp.float32)],
        ),
        compiler_params=pltpu.CompilerParams(
            dimension_semantics=("parallel",)),          # batches independent
        cost_estimate=cost,
    )(q, k, v, w_o)


# ----------------------------------------------------------------------------
# Full Multihead_Attention forward (three jitted paths + identity dispatcher)
# ----------------------------------------------------------------------------

def _attention_from_2d(q2, k2, v2, w_o, *, B, Sq, Sk, num_heads, out_dtype):
    H = w_o.shape[0]
    return _fused_attention(
        q2.reshape(B, Sq, H), k2.reshape(B, Sk, H), v2.reshape(B, Sk, H),
        w_o, num_heads=num_heads, out_dtype=out_dtype)


@functools.partial(jax.jit, static_argnames=("num_heads",))
def _mha_self(x, w_q, w_k, w_v, w_o, *, num_heads):
    """query is key is value: fused Q/K/V projection (activation read once)."""
    B, S, _ = x.shape
    q2, k2, v2 = _fused_proj(x.reshape(B * S, -1), (w_q, w_k, w_v))
    return _attention_from_2d(q2, k2, v2, w_o, B=B, Sq=S, Sk=S,
                              num_heads=num_heads, out_dtype=x.dtype)


@functools.partial(jax.jit, static_argnames=("num_heads",))
def _mha_kv_shared(query, kv, w_q, w_k, w_v, w_o, *, num_heads):
    """key is value: fused K/V projection."""
    B, Sq, _ = query.shape
    Sk = kv.shape[1]
    (q2,) = _fused_proj(query.reshape(B * Sq, -1), (w_q,))
    k2, v2 = _fused_proj(kv.reshape(B * Sk, -1), (w_k, w_v))
    return _attention_from_2d(q2, k2, v2, w_o, B=B, Sq=Sq, Sk=Sk,
                              num_heads=num_heads, out_dtype=query.dtype)


@functools.partial(jax.jit, static_argnames=("num_heads",))
def _mha_general(query, key, value, w_q, w_k, w_v, w_o, *, num_heads):
    """Fully general cross-attention: separate projections."""
    B, Sq, _ = query.shape
    Sk = key.shape[1]
    (q2,) = _fused_proj(query.reshape(B * Sq, -1), (w_q,))
    (k2,) = _fused_proj(key.reshape(B * Sk, -1), (w_k,))
    (v2,) = _fused_proj(value.reshape(B * Sk, -1), (w_v,))
    return _attention_from_2d(q2, k2, v2, w_o, B=B, Sq=Sq, Sk=Sk,
                              num_heads=num_heads, out_dtype=query.dtype)


def multihead_attention(query, key, value, w_q, w_k, w_v, w_o, *,
                        num_heads, knowledge=None):
    """query: (B,Sq,Dq), key: (B,Sk,Dk), value: (B,Sk,Dv) -> (B,Sq,H).

    Weights are stored as (in_features, out_features) so y = x @ W, equivalent
    to PyTorch nn.Linear(bias=False).  The projection-fusion path is chosen by
    object identity (query is key is value / key is value).
    """
    if knowledge is not None:
        # PyTorch: knowledge (1, Kd, H) is prepended to key/value BEFORE w_k/w_v.
        B = key.shape[0]
        kn = jnp.broadcast_to(knowledge, (B,) + knowledge.shape[1:]).astype(key.dtype)
        key = jnp.concatenate([kn, key], axis=1)
        value = jnp.concatenate([kn, value], axis=1)
    if query is key and key is value:
        return _mha_self(query, w_q, w_k, w_v, w_o, num_heads=num_heads)
    if key is value:
        return _mha_kv_shared(query, key, w_q, w_k, w_v, w_o, num_heads=num_heads)
    return _mha_general(query, key, value, w_q, w_k, w_v, w_o, num_heads=num_heads)


# ----------------------------------------------------------------------------
# init + pure-JAX reference + demo
# ----------------------------------------------------------------------------

def init_params(key, query_size, key_size, value_size, hidden_size,
                dtype=jnp.float32):
    """nn.Linear(bias=False)-style init, stored as (in, out)."""
    ks = jax.random.split(key, 4)

    def lin(k, fan_in, fan_out):
        lim = 1.0 / math.sqrt(fan_in)
        return jax.random.uniform(k, (fan_in, fan_out), dtype, -lim, lim)

    w_q = lin(ks[0], query_size, hidden_size)
    w_k = lin(ks[1], key_size, hidden_size)
    w_v = lin(ks[2], value_size, hidden_size)
    w_o = lin(ks[3], hidden_size, hidden_size)
    return w_q, w_k, w_v, w_o


def ref_mha(query, key, value, w_q, w_k, w_v, w_o, num_heads, knowledge=None):
    """Pure-JAX reference mirroring the PyTorch module (high-precision matmuls)."""
    hp = jax.lax.Precision.HIGHEST
    if knowledge is not None:
        kn = jnp.broadcast_to(knowledge, (key.shape[0],) + knowledge.shape[1:])
        key = jnp.concatenate([kn, key], axis=1)
        value = jnp.concatenate([kn, value], axis=1)
    B, Sq, _ = query.shape
    H = w_q.shape[1]
    Dh = H // num_heads

    def tq(x):
        b, s, _ = x.shape
        return (x.reshape(b, s, num_heads, Dh)
                 .transpose(0, 2, 1, 3)
                 .reshape(b * num_heads, s, Dh))

    q = tq(jnp.matmul(query, w_q, precision=hp))
    k = tq(jnp.matmul(key, w_k, precision=hp))
    v = tq(jnp.matmul(value, w_v, precision=hp))
    s = jnp.einsum("bqd,bkd->bqk", q, k, precision=hp)   # unscaled, like the module
    w = jax.nn.softmax(s, axis=-1)
    o = jnp.einsum("bqk,bkd->bqd", w, v, precision=hp)
    o = (o.reshape(B, num_heads, Sq, Dh)
          .transpose(0, 2, 1, 3)
          .reshape(B, Sq, H))
    return jnp.matmul(o, w_o, precision=hp)


if __name__ == "__main__":
    # Small shapes consistent with the module:
    # batch=2, seq=8, query/key/value size=32, hidden=64, heads=4 (head dim 16).
    B, Sq, Sk = 2, 8, 8
    Dq = Dk = Dv = 32
    H, NH = 64, 4

    root = jax.random.PRNGKey(0)
    kq, kk, kv, kp = jax.random.split(root, 4)
    query = jax.random.normal(kq, (B, Sq, Dq), dtype=jnp.float32)
    key_in = jax.random.normal(kk, (B, Sk, Dk), dtype=jnp.float32)
    value = jax.random.normal(kv, (B, Sk, Dv), dtype=jnp.float32)
    w_q, w_k, w_v, w_o = init_params(kp, Dq, Dk, Dv, H)

    # Tolerance: MXU inputs are cast to bf16 (f32 accumulation/softmax), and
    # attention probs are rounded to bf16 before the PV matmul (standard flash
    # practice).  Semantic errors would be O(1); bf16 rounding is O(1e-2) here.
    tol = dict(atol=3e-2, rtol=3e-2)

    # 1) cross-attention (general path: separate projections)
    out = jax.block_until_ready(
        multihead_attention(query, key_in, value, w_q, w_k, w_v, w_o, num_heads=NH))
    ref = ref_mha(query, key_in, value, w_q, w_k, w_v, w_o, NH)
    assert out.shape == (B, Sq, H)
    assert jnp.allclose(out, ref, **tol), "cross-attention mismatch vs reference"

    # 2) key-is-value path (fused K/V projection)
    out = jax.block_until_ready(
        multihead_attention(query, key_in, key_in, w_q, w_k, w_v, w_o, num_heads=NH))
    ref = ref_mha(query, key_in, key_in, w_q, w_k, w_v, w_o, NH)
    assert jnp.allclose(out, ref, **tol), "kv-shared mismatch vs reference"

    # 3) self-attention path (fused Q/K/V projection)
    out = jax.block_until_ready(
        multihead_attention(query, query, query, w_q, w_k, w_v, w_o, num_heads=NH))
    ref = ref_mha(query, query, query, w_q, w_k, w_v, w_o, NH)
    assert jnp.allclose(out, ref, **tol), "self-attention mismatch vs reference"

    print("KERNEL_OK")
</pallas_src>

<mosaic_0001>
module attributes {stable_mosaic.version = 11 : i64} {
  func.func @_proj_kernel(%arg0: i32, %arg1: memref<16x32xf32, #tpu.memory_space<vmem>>, %arg2: memref<32x64xbf16, #tpu.memory_space<vmem>>, %arg3: memref<16x64xbf16, #tpu.memory_space<vmem>>) attributes {dimension_semantics = [#tpu.dimension_semantics<parallel>], iteration_bounds = array<i64: 1>, scalar_prefetch = 0 : i64, scratch_operands = 0 : i64, tpu.core_type = #tpu.core_type<tc>, window_params = [{transform_indices = @transform_0, window_bounds = array<i64: 16, 32>}, {pipeline_mode = #tpu.pipeline_mode<synchronous>, transform_indices = @transform_1, window_bounds = array<i64: 32, 64>}, {transform_indices = @transform_2, window_bounds = array<i64: 16, 64>}]} {
    %c0 = arith.constant 0 : index
    %c0_0 = arith.constant 0 : index
    %0 = vector.load %arg1[%c0, %c0_0] : memref<16x32xf32, #tpu.memory_space<vmem>>, vector<16x32xf32>
    %1 = arith.truncf %0 : vector<16x32xf32> to vector<16x32xbf16>
    %c0_1 = arith.constant 0 : index
    %c0_2 = arith.constant 0 : index
    %2 = vector.load %arg2[%c0_1, %c0_2] : memref<32x64xbf16, #tpu.memory_space<vmem>>, vector<32x64xbf16>
    %cst = arith.constant dense<0.000000e+00> : vector<16x64xf32>
    %3 = tpu.matmul %1, %2, %cst {dimension_numbers = #tpu.dot_dimension_numbers<[1], [0], [0], [1], [0, 0, 1, 1], [], []>} : vector<16x32xbf16>, vector<32x64xbf16>, vector<16x64xf32> -> vector<16x64xf32>
    %4 = arith.truncf %3 : vector<16x64xf32> to vector<16x64xbf16>
    %c0_3 = arith.constant 0 : index
    %c0_4 = arith.constant 0 : index
    %5 = vector.load %arg3[%c0_3, %c0_4] : memref<16x64xbf16, #tpu.memory_space<vmem>>, vector<16x64xbf16>
    tpu.vector_store %arg3[%c0_3, %c0_4], %4 {strides = array<i32>} : memref<16x64xbf16, #tpu.memory_space<vmem>>, vector<16x64xbf16>,
    return
  }
  func.func @transform_0(%arg0: i32) -> (i32, i32) {
    %c0_i32 = arith.constant 0 : i32
    %c0_i32_0 = arith.constant 0 : i32
    return %arg0, %c0_i32 : i32, i32
  }
  func.func @transform_1(%arg0: i32) -> (i32, i32) {
    %c0_i32 = arith.constant 0 : i32
    %c0_i32_0 = arith.constant 0 : i32
    %c0_i32_1 = arith.constant 0 : i32
    return %c0_i32, %c0_i32_0 : i32, i32
  }
  func.func @transform_2(%arg0: i32) -> (i32, i32) {
    %c0_i32 = arith.constant 0 : i32
    %c0_i32_0 = arith.constant 0 : i32
    return %arg0, %c0_i32 : i32, i32
  }
}

module attributes {stable_mosaic.version = 11 : i64} {
  func.func @_attn_kernel(%arg0: i32, %arg1: memref<1x8x64xbf16, #tpu.memory_space<vmem>>, %arg2: memref<1x8x64xbf16, #tpu.memory_space<vmem>>, %arg3: memref<1x8x64xbf16, #tpu.memory_space<vmem>>, %arg4: memref<64x64xbf16, #tpu.memory_space<vmem>>, %arg5: memref<1x8x64xf32, #tpu.memory_space<vmem>>, %arg6: memref<8x64xf32, #tpu.memory_space<vmem>>) attributes {dimension_semantics = [#tpu.dimension_semantics<parallel>], iteration_bounds = array<i64: 2>, scalar_prefetch = 0 : i64, scratch_operands = 1 : i64, tpu.core_type = #tpu.core_type<tc>, window_params = [{transform_indices = @transform_0, window_bounds = array<i64: 1, 8, 64>}, {transform_indices = @transform_1, window_bounds = array<i64: 1, 8, 64>}, {transform_indices = @transform_2, window_bounds = array<i64: 1, 8, 64>}, {pipeline_mode = #tpu.pipeline_mode<synchronous>, transform_indices = @transform_3, window_bounds = array<i64: 64, 64>}, {transform_indices = @transform_4, window_bounds = array<i64: 1, 8, 64>}]} {
    %c0 = arith.constant 0 : index
    %c0_0 = arith.constant 0 : index
    %c0_1 = arith.constant 0 : index
    %0 = vector.load %arg1[%c0, %c0_0, %c0_1] : memref<1x8x64xbf16, #tpu.memory_space<vmem>>, vector<1x8x16xbf16>
    %1 = vector.shape_cast %0 : vector<1x8x16xbf16> to vector<8x16xbf16>
    %c0_2 = arith.constant 0 : index
    %c0_3 = arith.constant 0 : index
    %c0_4 = arith.constant 0 : index
    %2 = vector.load %arg2[%c0_2, %c0_3, %c0_4] : memref<1x8x64xbf16, #tpu.memory_space<vmem>>, vector<1x8x16xbf16>
    %3 = vector.shape_cast %2 : vector<1x8x16xbf16> to vector<8x16xbf16>
    %c0_5 = arith.constant 0 : index
    %c0_6 = arith.constant 0 : index
    %c0_7 = arith.constant 0 : index
    %4 = vector.load %arg3[%c0_5, %c0_6, %c0_7] : memref<1x8x64xbf16, #tpu.memory_space<vmem>>, vector<1x8x16xbf16>
    %5 = vector.shape_cast %4 : vector<1x8x16xbf16> to vector<8x16xbf16>
    %cst = arith.constant dense<0.000000e+00> : vector<8x8xf32>
    %6 = tpu.matmul %1, %3, %cst {dimension_numbers = #tpu.dot_dimension_numbers<[1], [1], [0], [0], [0, 0, 1, 0], [], []>} : vector<8x16xbf16>, vector<8x16xbf16>, vector<8x8xf32> -> vector<8x8xf32>
    %cst_8 = arith.constant dense<0xFF800000> : vector<8xf32>
    %7 = vector.multi_reduction <maximumf>, %6, %cst_8 [1] : vector<8x8xf32> to vector<8xf32>
    %8 = vector.shape_cast %7 : vector<8xf32> to vector<8x1xf32>
    %9 = vector.broadcast %8 : vector<8x1xf32> to vector<8x8xf32>
    %10 = arith.subf %6, %9 : vector<8x8xf32>
    %11 = math.exp %10 : vector<8x8xf32>
    %cst_9 = arith.constant dense<0.000000e+00> : vector<8xf32>
    %12 = vector.multi_reduction <add>, %11, %cst_9 [1] : vector<8x8xf32> to vector<8xf32>
    %13 = vector.shape_cast %12 : vector<8xf32> to vector<8x1xf32>
    %14 = tpu.reciprocal %13 {approx = true} : vector<8x1xf32> -> vector<8x1xf32>
    %15 = vector.broadcast %14 : vector<8x1xf32> to vector<8x8xf32>
    %16 = arith.mulf %11, %15 : vector<8x8xf32>
    %17 = arith.truncf %16 : vector<8x8xf32> to vector<8x8xbf16>
    %cst_10 = arith.constant dense<0.000000e+00> : vector<8x16xf32>
    %18 = tpu.matmul %17, %5, %cst_10 {dimension_numbers = #tpu.dot_dimension_numbers<[1], [0], [0], [1], [0, 0, 1, 1], [], []>} : vector<8x8xbf16>, vector<8x16xbf16>, vector<8x16xf32> -> vector<8x16xf32>
    %c0_11 = arith.constant 0 : index
    %c0_12 = arith.constant 0 : index
    %19 = vector.load %arg6[%c0_11, %c0_12] : memref<8x64xf32, #tpu.memory_space<vmem>>, vector<8x16xf32>
    tpu.vector_store %arg6[%c0_11, %c0_12], %18 {strides = array<i32>} : memref<8x64xf32, #tpu.memory_space<vmem>>, vector<8x16xf32>,
    %c0_13 = arith.constant 0 : index
    %c0_14 = arith.constant 0 : index
    %c16 = arith.constant 16 : index
    %20 = vector.load %arg1[%c0_13, %c0_14, %c16] : memref<1x8x64xbf16, #tpu.memory_space<vmem>>, vector<1x8x16xbf16>
    %21 = vector.shape_cast %20 : vector<1x8x16xbf16> to vector<8x16xbf16>
    %c0_15 = arith.constant 0 : index
    %c0_16 = arith.constant 0 : index
    %c16_17 = arith.constant 16 : index
    %22 = vector.load %arg2[%c0_15, %c0_16, %c16_17] : memref<1x8x64xbf16, #tpu.memory_space<vmem>>, vector<1x8x16xbf16>
    %23 = vector.shape_cast %22 : vector<1x8x16xbf16> to vector<8x16xbf16>
    %c0_18 = arith.constant 0 : index
    %c0_19 = arith.constant 0 : index
    %c16_20 = arith.constant 16 : index
    %24 = vector.load %arg3[%c0_18, %c0_19, %c16_20] : memref<1x8x64xbf16, #tpu.memory_space<vmem>>, vector<1x8x16xbf16>
    %25 = vector.shape_cast %24 : vector<1x8x16xbf16> to vector<8x16xbf16>
    %cst_21 = arith.constant dense<0.000000e+00> : vector<8x8xf32>
    %26 = tpu.matmul %21, %23, %cst_21 {dimension_numbers = #tpu.dot_dimension_numbers<[1], [1], [0], [0], [0, 0, 1, 0], [], []>} : vector<8x16xbf16>, vector<8x16xbf16>, vector<8x8xf32> -> vector<8x8xf32>
    %cst_22 = arith.constant dense<0xFF800000> : vector<8xf32>
    %27 = vector.multi_reduction <maximumf>, %26, %cst_22 [1] : vector<8x8xf32> to vector<8xf32>
    %28 = vector.shape_cast %27 : vector<8xf32> to vector<8x1xf32>
    %29 = vector.broadcast %28 : vector<8x1xf32> to vector<8x8xf32>
    %30 = arith.subf %26, %29 : vector<8x8xf32>
    %31 = math.exp %30 : vector<8x8xf32>
    %cst_23 = arith.constant dense<0.000000e+00> : vector<8xf32>
    %32 = vector.multi_reduction <add>, %31, %cst_23 [1] : vector<8x8xf32> to vector<8xf32>
    %33 = vector.shape_cast %32 : vector<8xf32> to vector<8x1xf32>
    %34 = tpu.reciprocal %33 {approx = true} : vector<8x1xf32> -> vector<8x1xf32>
    %35 = vector.broadcast %34 : vector<8x1xf32> to vector<8x8xf32>
    %36 = arith.mulf %31, %35 : vector<8x8xf32>
    %37 = arith.truncf %36 : vector<8x8xf32> to vector<8x8xbf16>
    %cst_24 = arith.constant dense<0.000000e+00> : vector<8x16xf32>
    %38 = tpu.matmul %37, %25, %cst_24 {dimension_numbers = #tpu.dot_dimension_numbers<[1], [0], [0], [1], [0, 0, 1, 1], [], []>} : vector<8x8xbf16>, vector<8x16xbf16>, vector<8x16xf32> -> vector<8x16xf32>
    %c0_25 = arith.constant 0 : index
    %c16_26 = arith.constant 16 : index
    %39 = vector.load %arg6[%c0_25, %c16_26] : memref<8x64xf32, #tpu.memory_space<vmem>>, vector<8x16xf32>
    tpu.vector_store %arg6[%c0_25, %c16_26], %38 {strides = array<i32>} : memref<8x64xf32, #tpu.memory_space<vmem>>, vector<8x16xf32>,
    %c0_27 = arith.constant 0 : index
    %c0_28 = arith.constant 0 : index
    %c32 = arith.constant 32 : index
    %40 = vector.load %arg1[%c0_27, %c0_28, %c32] : memref<1x8x64xbf16, #tpu.memory_space<vmem>>, vector<1x8x16xbf16>
    %41 = vector.shape_cast %40 : vector<1x8x16xbf16> to vector<8x16xbf16>
    %c0_29 = arith.constant 0 : index
    %c0_30 = arith.constant 0 : index
    %c32_31 = arith.constant 32 : index
    %42 = vector.load %arg2[%c0_29, %c0_30, %c32_31] : memref<1x8x64xbf16, #tpu.memory_space<vmem>>, vector<1x8x16xbf16>
    %43 = vector.shape_cast %42 : vector<1x8x16xbf16> to vector<8x16xbf16>
    %c0_32 = arith.constant 0 : index
    %c0_33 = arith.constant 0 : index
    %c32_34 = arith.constant 32 : index
    %44 = vector.load %arg3[%c0_32, %c0_33, %c32_34] : memref<1x8x64xbf16, #tpu.memory_space<vmem>>, vector<1x8x16xbf16>
    %45 = vector.shape_cast %44 : vector<1x8x16xbf16> to vector<8x16xbf16>
    %cst_35 = arith.constant dense<0.000000e+00> : vector<8x8xf32>
    %46 = tpu.matmul %41, %43, %cst_35 {dimension_numbers = #tpu.dot_dimension_numbers<[1], [1], [0], [0], [0, 0, 1, 0], [], []>} : vector<8x16xbf16>, vector<8x16xbf16>, vector<8x8xf32> -> vector<8x8xf32>
    %cst_36 = arith.constant dense<0xFF800000> : vector<8xf32>
    %47 = vector.multi_reduction <maximumf>, %46, %cst_36 [1] : vector<8x8xf32> to vector<8xf32>
    %48 = vector.shape_cast %47 : vector<8xf32> to vector<8x1xf32>
    %49 = vector.broadcast %48 : vector<8x1xf32> to vector<8x8xf32>
    %50 = arith.subf %46, %49 : vector<8x8xf32>
    %51 = math.exp %50 : vector<8x8xf32>
    %cst_37 = arith.constant dense<0.000000e+00> : vector<8xf32>
    %52 = vector.multi_reduction <add>, %51, %cst_37 [1] : vector<8x8xf32> to vector<8xf32>
    %53 = vector.shape_cast %52 : vector<8xf32> to vector<8x1xf32>
    %54 = tpu.reciprocal %53 {approx = true} : vector<8x1xf32> -> vector<8x1xf32>
    %55 = vector.broadcast %54 : vector<8x1xf32> to vector<8x8xf32>
    %56 = arith.mulf %51, %55 : vector<8x8xf32>
    %57 = arith.truncf %56 : vector<8x8xf32> to vector<8x8xbf16>
    %cst_38 = arith.constant dense<0.000000e+00> : vector<8x16xf32>
    %58 = tpu.matmul %57, %45, %cst_38 {dimension_numbers = #tpu.dot_dimension_numbers<[1], [0], [0], [1], [0, 0, 1, 1], [], []>} : vector<8x8xbf16>, vector<8x16xbf16>, vector<8x16xf32> -> vector<8x16xf32>
    %c0_39 = arith.constant 0 : index
    %c32_40 = arith.constant 32 : index
    %59 = vector.load %arg6[%c0_39, %c32_40] : memref<8x64xf32, #tpu.memory_space<vmem>>, vector<8x16xf32>
    tpu.vector_store %arg6[%c0_39, %c32_40], %58 {strides = array<i32>} : memref<8x64xf32, #tpu.memory_space<vmem>>, vector<8x16xf32>,
    %c0_41 = arith.constant 0 : index
    %c0_42 = arith.constant 0 : index
    %c48 = arith.constant 48 : index
    %60 = vector.load %arg1[%c0_41, %c0_42, %c48] : memref<1x8x64xbf16, #tpu.memory_space<vmem>>, vector<1x8x16xbf16>
    %61 = vector.shape_cast %60 : vector<1x8x16xbf16> to vector<8x16xbf16>
    %c0_43 = arith.constant 0 : index
    %c0_44 = arith.constant 0 : index
    %c48_45 = arith.constant 48 : index
    %62 = vector.load %arg2[%c0_43, %c0_44, %c48_45] : memref<1x8x64xbf16, #tpu.memory_space<vmem>>, vector<1x8x16xbf16>
    %63 = vector.shape_cast %62 : vector<1x8x16xbf16> to vector<8x16xbf16>
    %c0_46 = arith.constant 0 : index
    %c0_47 = arith.constant 0 : index
    %c48_48 = arith.constant 48 : index
    %64 = vector.load %arg3[%c0_46, %c0_47, %c48_48] : memref<1x8x64xbf16, #tpu.memory_space<vmem>>, vector<1x8x16xbf16>
    %65 = vector.shape_cast %64 : vector<1x8x16xbf16> to vector<8x16xbf16>
    %cst_49 = arith.constant dense<0.000000e+00> : vector<8x8xf32>
    %66 = tpu.matmul %61, %63, %cst_49 {dimension_numbers = #tpu.dot_dimension_numbers<[1], [1], [0], [0], [0, 0, 1, 0], [], []>} : vector<8x16xbf16>, vector<8x16xbf16>, vector<8x8xf32> -> vector<8x8xf32>
    %cst_50 = arith.constant dense<0xFF800000> : vector<8xf32>
    %67 = vector.multi_reduction <maximumf>, %66, %cst_50 [1] : vector<8x8xf32> to vector<8xf32>
    %68 = vector.shape_cast %67 : vector<8xf32> to vector<8x1xf32>
    %69 = vector.broadcast %68 : vector<8x1xf32> to vector<8x8xf32>
    %70 = arith.subf %66, %69 : vector<8x8xf32>
    %71 = math.exp %70 : vector<8x8xf32>
    %cst_51 = arith.constant dense<0.000000e+00> : vector<8xf32>
    %72 = vector.multi_reduction <add>, %71, %cst_51 [1] : vector<8x8xf32> to vector<8xf32>
    %73 = vector.shape_cast %72 : vector<8xf32> to vector<8x1xf32>
    %74 = tpu.reciprocal %73 {approx = true} : vector<8x1xf32> -> vector<8x1xf32>
    %75 = vector.broadcast %74 : vector<8x1xf32> to vector<8x8xf32>
    %76 = arith.mulf %71, %75 : vector<8x8xf32>
    %77 = arith.truncf %76 : vector<8x8xf32> to vector<8x8xbf16>
    %cst_52 = arith.constant dense<0.000000e+00> : vector<8x16xf32>
    %78 = tpu.matmul %77, %65, %cst_52 {dimension_numbers = #tpu.dot_dimension_numbers<[1], [0], [0], [1], [0, 0, 1, 1], [], []>} : vector<8x8xbf16>, vector<8x16xbf16>, vector<8x16xf32> -> vector<8x16xf32>
    %c0_53 = arith.constant 0 : index
    %c48_54 = arith.constant 48 : index
    %79 = vector.load %arg6[%c0_53, %c48_54] : memref<8x64xf32, #tpu.memory_space<vmem>>, vector<8x16xf32>
    tpu.vector_store %arg6[%c0_53, %c48_54], %78 {strides = array<i32>} : memref<8x64xf32, #tpu.memory_space<vmem>>, vector<8x16xf32>,
    %c0_55 = arith.constant 0 : index
    %c0_56 = arith.constant 0 : index
    %80 = vector.load %arg6[%c0_55, %c0_56] : memref<8x64xf32, #tpu.memory_space<vmem>>, vector<8x64xf32>
    %81 = arith.truncf %80 : vector<8x64xf32> to vector<8x64xbf16>
    %c0_57 = arith.constant 0 : index
    %c0_58 = arith.constant 0 : index
    %82 = vector.load %arg4[%c0_57, %c0_58] : memref<64x64xbf16, #tpu.memory_space<vmem>>, vector<64x64xbf16>
    %cst_59 = arith.constant dense<0.000000e+00> : vector<8x64xf32>
    %83 = tpu.matmul %81, %82, %cst_59 {dimension_numbers = #tpu.dot_dimension_numbers<[1], [0], [0], [1], [0, 0, 1, 1], [], []>} : vector<8x64xbf16>, vector<64x64xbf16>, vector<8x64xf32> -> vector<8x64xf32>
    %c0_60 = arith.constant 0 : index
    %c0_61 = arith.constant 0 : index
    %c0_62 = arith.constant 0 : index
    %84 = vector.load %arg5[%c0_60, %c0_61, %c0_62] : memref<1x8x64xf32, #tpu.memory_space<vmem>>, vector<1x8x64xf32>
    %85 = vector.shape_cast %84 : vector<1x8x64xf32> to vector<8x64xf32>
    %86 = vector.shape_cast %83 : vector<8x64xf32> to vector<1x8x64xf32>
    tpu.vector_store %arg5[%c0_60, %c0_61, %c0_62], %86 {strides = array<i32>} : memref<1x8x64xf32, #tpu.memory_space<vmem>>, vector<1x8x64xf32>,
    return
  }
  func.func @transform_0(%arg0: i32) -> (i32, i32, i32) {
    %c0_i32 = arith.constant 0 : i32
    %c0_i32_0 = arith.constant 0 : i32
    %c0_i32_1 = arith.constant 0 : i32
    return %arg0, %c0_i32, %c0_i32_0 : i32, i32, i32
  }
  func.func @transform_1(%arg0: i32) -> (i32, i32, i32) {
    %c0_i32 = arith.constant 0 : i32
    %c0_i32_0 = arith.constant 0 : i32
    %c0_i32_1 = arith.constant 0 : i32
    return %arg0, %c0_i32, %c0_i32_0 : i32, i32, i32
  }
  func.func @transform_2(%arg0: i32) -> (i32, i32, i32) {
    %c0_i32 = arith.constant 0 : i32
    %c0_i32_0 = arith.constant 0 : i32
    %c0_i32_1 = arith.constant 0 : i32
    return %arg0, %c0_i32, %c0_i32_0 : i32, i32, i32
  }
  func.func @transform_3(%arg0: i32) -> (i32, i32) {
    %c0_i32 = arith.constant 0 : i32
    %c0_i32_0 = arith.constant 0 : i32
    %c0_i32_1 = arith.constant 0 : i32
    return %c0_i32, %c0_i32_0 : i32, i32
  }
  func.func @transform_4(%arg0: i32) -> (i32, i32, i32) {
    %c0_i32 = arith.constant 0 : i32
    %c0_i32_0 = arith.constant 0 : i32
    %c0_i32_1 = arith.constant 0 : i32
    return %arg0, %c0_i32, %c0_i32_0 : i32, i32, i32
  }
}

</mosaic_0001>

<bundles_post_ra>
// kernel: _mha_general.4
= control target key start
LH: loop header
LB: loop body
LE: loop exit
PB: predicated region body
PF: predicated region fallthrough
CT: control target
= control target key end

     0   :  { %vm31_vm0 = vcmask 261120   ;;  %vm51_vm1 = vcmask 519168   ;;  %s102_s1 = inlined_call_operand.vmem [shape: bf16[32,64], index: 1, kind: input, shape index: {}]   ;;  %s103_s0 = inlined_call_operand.vmem [shape: f32[16,32], index: 0, kind: input, shape index: {}]   ;;  %s104_s2 = inlined_call_operand.vmem [shape: bf16[16,64], index: 2, kind: output, shape index: {}]  }
   0x1   :  { %v68_v0 = vld [vmem:[%s102_s1 + $0x8] sm:$0xff]  ;;  %v67_v1 = vld [vmem:[%s102_s1] sm:$0xff] }
   0x2   :  { %41 = vmatpush.bf16.msra.mxu0 %v68_v0  ;;  %v12_v2 = vld [vmem:[%s103_s0] sm:$0xff]  ;;  %v13_v3 = vld [vmem:[%s103_s0 + $0x8] sm:$0xff] }
   0x3   :  { %v14_v4 = vpack.c.bf16 %v13_v3, %v12_v2 }
   0x6   :  { %42 = vmatpush.bf16.msra.mxu0 %v67_v1 }
   0x9   :  { %66 = vmatmul.msk.bf16.vlgmr.msra.gmra.mxu0 %vm31_vm0, %v14_v4 }
  0x86   :  { %v44_v5 = vpop.f32.mrf.mxu0 }
  0x87   :  { %v49_v6 = vpack.c.bf16 %v44_v5, %v44_v5 }
  0x89   :  { %52 = vst.msk [vmem:[%s104_s2] sm:$0xf] %vm51_vm1, %v49_v6 }
  0x8e   :  { %v46_v7 = vpop.f32.mrf.mxu0 }
  0x8f   :  { %v50_v8 = vpack.c.bf16 %v46_v7, %v46_v7 }
  0x91   :  { %53 = vst.msk [vmem:[%s104_s2 + $0x4] sm:$0xf] %vm51_vm1, %v50_v8 }

// kernel: _mha_general.7
= control target key start
LH: loop header
LB: loop body
LE: loop exit
PB: predicated region body
PF: predicated region fallthrough
CT: control target
= control target key end

     0   :  { %9 = vsyncpa [#allocation4], 0  ;;  %s1009_s0 = inlined_call_operand.vmem [shape: bf16[2,8,64], index: 0, kind: input, shape index: {}]   ;;  %s1010_s1 = inlined_call_operand.vmem [shape: bf16[2,8,64], index: 1, kind: input, shape index: {}]   ;;  %s1011_s2 = inlined_call_operand.vmem [shape: bf16[2,8,64], index: 2, kind: input, shape index: {}]   ;;  %s1012_s3 = inlined_call_operand.vmem [shape: bf16[64,64], index: 3, kind: input, shape index: {}]   ;;  %s1013_s4 = inlined_call_operand.hbm [shape: f32[2,8,64], index: 4, kind: output, shape index: {}]  }
   0x1   :  { %11 = vsyncpa [#allocation4 + $0x1], 0  ;;  %s855_s15 = smov 0   ;;  %s857_s16 = smov 0  }
   0x2   :  { %s859_s17 = smov 0   ;;  %s861_s18 = smov 0  }
   0x3 LB: > { %s876_s19 = sadd.s32 4294967295, %s822_s18   ;;  %s658_s20 = sadd.s32 4294967294, %s822_s18   ;;  %s822_s18 = sphi %s861_s18, %s1019_s18   ;;  %s818_s17 = sphi %s859_s17, %s1018_s17   ;;  %s814_s16 = sphi %s857_s16, %s1017_s16   ;;  %s810_s15 = sphi %s855_s15, %s1016_s15  }
   0x4   : > { %s880_s21 = sadd.s32 1, %s822_s18   ;;  %s123_s22 = sadd.s32 1, %s818_s17 }
   0x5   : > { %s120_s23 = ssub.s32 %s822_s18, %s880_s21  ;;  %p133_p0 = scmp.ne.s32.totalorder %s818_s17, %s814_s16 }
   0x6   : > { %p121_p1 = scmp.eq.s32.totalorder %s120_s23, 0  ;;  %p134_p2 = scmp.eq.s32.totalorder %s876_s19, 1 }
   0x7   : > { %p139_p3 = scmp.ne.s32.totalorder %s814_s16, %s810_s15  ;;  %p140_p4 = scmp.eq.s32.totalorder %s658_s20, 1 }
   0x8   : > { %s891_s24 = scalar_select %p121_p1, %s818_s17, %s123_s22  }
   0x9   : > { %p893_p5 = por %p134_p2, %p133_p0  ;;  %p897_p6 = por %p140_p4, %p139_p3 }
   0xa   : > { %p661_p7 = scmp.ge.s32.totalorder %s822_s18, 1  ;;  %p182_p8 = scmp.lt.s32.totalorder %s822_s18, 3 }
   0xc   : > { %p183_p9 = pnand %p661_p7, %p182_p8 }
   0xd   : > { %p215_p10 = scmp.lt.s32.totalorder (!%p183_p9), %s876_s19, 1  ;;  %s824_s9 = smov (!%p183_p9), 96  }
   0xe   : > { %186 = sbr.rel (%p183_p9) target bundleno = 1226 (0x4ca), region = 36  ;;  %s825_s10 = smov (!%p183_p9), 80  }
   0xf   : > { %s826_s11 = smov (!%p183_p9), 112   ;;  %s827_s20 = smov (!%p183_p9), 16  }
  0x10   : > { %s828_s22 = smov (!%p183_p9), 32   ;;  %s829_s23 = smov (!%p183_p9), 48  }
  0x13   : > { %s216_s27 = scalar_select %p215_p10, %s876_s19, 1  ;;  %vm231_vm0 = vcmask 130048   ;;  %vm251_vm1 = vcmask 64512   ;;  %vm267_vm2 = vcmask 1043456   ;;  %vm357_vm3 = vcmask 261248  }
  0x14   : > { %vm431_vm4 = vcmask 392448   ;;  %vm505_vm5 = vcmask 523648   ;;  %vm541_vm6 = vcmask 523264  }
  0x15   : > { %s905_s28 = sshll.u32 %s216_s27, 2 }
  0x16   : > { %s222_s5 = scalar_lea.vmem %s1010_s1, %s905_s28  ;;  %s916_s8 = scalar_lea.vmem %s1009_s0, %s905_s28 }
  0x17   : > { %v229_v0 = vld [vmem:[%s222_s5] sm:$0xf]  ;;  %s937_s14 = scalar_lea.vmem %s1011_s2, %s905_s28 }
  0x18   : > { %v236_v1 = vsel %vm231_vm0, %v229_v0, 0  ;;  %v228_v2 = vld [vmem:[%s916_s8] sm:$0xf] }
  0x19   : > { %245 = vmatpush.bf16.xpose.msra.mxu0 %v236_v1  ;;  %v360_v3 = vld [vmem:[%s222_s5] sm:$0xf] }
  0x1a   : > { %v368_v4 = vunpack.c.l.b16 %v360_v3  ;;  %v434_v5 = vld [vmem:[%s222_s5] sm:$0xf] }
  0x1b   : > { %v442_v7 = vunpack.c.l.b16 %v434_v5  ;;  %v359_v9 = vld [vmem:[%s916_s8] sm:$0xf] }
  0x1c   : > { %v369_v6 = vpack.c.b16 %v368_v4, %v368_v4  ;;  %v363_v10 = vunpack.c.l.b16 %v359_v9  ;;  %v433_v12 = vld [vmem:[%s916_s8] sm:$0xf] }
  0x1d   : > { %v443_v8 = vpack.c.b16 %v442_v7, %v442_v7  ;;  %v437_v13 = vunpack.c.l.b16 %v433_v12  ;;  %v286_v18 = vld [vmem:[%s222_s5] sm:$0xf]  ;;  %s780_s5 = scalar_lea.hbm %s1013_s4, 16 }
  0x1e   : > { %370 = vrot.lane.b32.xlu2 %v369_v6, %s824_s9  ;;  %v364_v11 = vpack.c.b16 %v363_v10, %v363_v10  ;;  %v294_v19 = vunpack.c.l.b16 %v286_v18  ;;  %v285_v31 = vld [vmem:[%s916_s8] sm:$0xf] }
  0x1f   : > { %v438_v16 = vpack.c.b16 %v437_v13, %v437_v13  ;;  %v289_v32 = vunpack.c.l.b16 %v285_v31  ;;  %v230_v34 = vld [vmem:[%s937_s14] sm:$0xf] }
  0x20   : > { %666 = vmatmul.msk.bf16.vlgmr.msra.gmra.mxu0 %vm231_vm0, %v228_v2  ;;  %v295_v20 = vpack.c.b16 %v294_v19, %v294_v19  ;;  %v269_v35 = vsel %vm267_vm2, %v230_v34, 0  ;;  %v287_v1 = vld [vmem:[%s937_s14] sm:$0xf] }
  0x21   : > { %v290_v33 = vpack.c.b16 %v289_v32, %v289_v32  ;;  %278 = vmatpush.bf16.msra.mxu1 %v269_v35  ;;  %v330_v3 = vunpack.c.l.b16 %v287_v1  ;;  %v361_v9 = vld [vmem:[%s937_s14] sm:$0xf] }
  0x22   : > { %v404_v10 = vunpack.c.l.b16 %v361_v9 }
  0x23   : > { %v331_v5 = vpack.c.b16 %v330_v3, %v330_v3 }
  0x24   : > { %v405_v12 = vpack.c.b16 %v404_v10, %v404_v10 }
  0x26   : > { %444 = vrot.lane.b32.xlu2 %v443_v8, %s825_s10 }
  0x2e   : > { %365 = vrot.lane.b32.xlu2 %v364_v11, %s824_s9  ;;  %v435_v11 = vld [vmem:[%s937_s14] sm:$0xf] }
  0x2f   : > { %v478_v13 = vunpack.c.l.b16 %v435_v11 }
  0x36   : > { %439 = vrot.lane.b32.xlu2 %v438_v16, %s825_s10 }
  0x78   : > { %v371_v21 = vpop.permute.xlu2 %370 }
  0x79   : > { %v376_v36 = vsel %vm231_vm0, %v371_v21, 0 }
  0x7a   : > { %385 = vmatpush.bf16.xpose.msrb.mxu1 %v376_v36 }
  0x80   : > { %v445_v22 = vpop.permute.xlu2 %444 }
  0x81   : > { %v450_v27 = vsel %vm231_vm0, %v445_v22, 0 }
  0x82   : > { %459 = vmatpush.bf16.xpose.msrb.mxu0 %v450_v27 }
  0x88   : > { %v366_v26 = vpop.permute.xlu2 %365 }
  0x90   : > { %v440_v30 = vpop.permute.xlu2 %439 }
  0x91   : > { %672 = vmatmul.msk.bf16.vlgmr.msrb.gmra.mxu0 %vm231_vm0, %v440_v30 }
  0x9d   : > { %v247_v14 = vpop.f32.mrf.mxu0 }
  0x9e   : > { %v252_v15 = vsel %vm251_vm1, %v247_v14, -inf }
  0x9f   : > { %253 = vmax.xlane.f32.xlu0 %v252_v15 }
  0xa5   : > { %v249_v17 = vpop.f32.mrf.mxu0 }
  0xb3   : > { %296 = vrot.lane.b32.xlu0 %v295_v20, %s826_s11 }
 0x10e   : > { %v461_v43 = vpop.f32.mrf.mxu0 }
 0x10f   : > { %v465_v44 = vsel %vm251_vm1, %v461_v43, -inf }
 0x112   : > { %v254_v23 = vpop.xlane.xlu0 %253 }
 0x113   : > { %v255_v24 = vsub.f32 %v247_v14, %v254_v23  ;;  %v479_v14 = vpack.c.b16 %v478_v13, %v478_v13 }
 0x115   : > { %v256_v25 = vmul.f32 1.442695, %v255_v24 }
 0x116   : > { %v463_v45 = vpop.f32.mrf.mxu0 }
 0x117   : > { %744 = vpow2.f32 %v256_v25 }
 0x11d   : > { %v745_v28 = vpop.eup %744 }
 0x11e   : > { %v258_v29 = vsel %vm251_vm1, %v745_v28, 0.0 }
 0x11f   : > { %259 = vadd.xlane.f32.xlu1 %v258_v29 }
 0x125   : > { %v297_v37 = vpop.permute.xlu0 %296 }
 0x126   : > { %v302_v38 = vsel %vm231_vm0, %v297_v37, 0 }
 0x127   : > { %311 = vmatpush.bf16.xpose.msra.mxu2 %v302_v38 }
 0x138   : > { %291 = vrot.lane.b32.xlu1 %v290_v33, %s826_s11 }
 0x162   : > { %466 = vmax.xlane.f32.xlu1 %v465_v44 }
 0x192   : > { %v260_v39 = vpop.xlane.xlu1 %259 }
 0x193   : > { %746 = vrcp.f32 %v260_v39  ;;  %v698_v39 = vld [vmem:[%s1012_s3 + $0x18] sm:$0xff] }
 0x199   : > { %v747_v40 = vpop.eup %746 }
 0x19a   : > { %v262_v41 = vmul.f32 %v747_v40, %v745_v28  ;;  %v697_v40 = vld [vmem:[%s1012_s3 + $0x10] sm:$0xff] }
 0x19c   : > { %v263_v42 = vpack.c.bf16 %v262_v41, %v262_v41 }
 0x19e   : > { %667 = vmatmul.msk.bf16.vlgmr.msra.gmra.mxu1 %vm251_vm1, %v263_v42  ;;  %v696_v42 = vld [vmem:[%s1012_s3 + $0x8] sm:$0xff] }
 0x19f   : > { %549 = vmatpush.bf16.msra.mxu1 %v698_v39 }
 0x1a3   : > { %550 = vmatpush.bf16.msra.mxu1 %v697_v40 }
 0x1a7   : > { %551 = vmatpush.bf16.msra.mxu1 %v696_v42 }
 0x1aa   : > { %v292_v46 = vpop.permute.xlu1 %291 }
 0x1ab   : > { %668 = vmatmul.msk.bf16.vlgmr.msra.gmra.mxu2 %vm231_vm0, %v292_v46 }
 0x1ae   : > { %670 = vmatmul.msk.bf16.vlgmr.msrb.gmra.mxu1 %vm231_vm0, %v366_v26 }
 0x1d5   : > { %v467_v57 = vpop.xlane.xlu1 %466 }
 0x1d6   : > { %v468_v61 = vsub.f32 %v461_v43, %v467_v57  ;;  %v695_v43 = vld [vmem:[%s1012_s3] sm:$0xff] }
 0x1d7   : > { %552 = vmatpush.bf16.msra.mxu1 %v695_v43 }
 0x1d8   : > { %v469_v63 = vmul.f32 1.442695, %v468_v61 }
 0x21b   : > { %v280_v47 = vpop.f32.mrf.mxu1 }
 0x21c   : > { %284 = vst.msk [vmem:[#allocation2] sm:$0xff] %vm231_vm0, %v280_v47 }
 0x223   : > { %v282_v48 = vpop.f32.mrf.mxu1 }
 0x22b   : > { %v387_v49 = vpop.f32.mrf.mxu1 }
 0x22c   : > { %v391_v50 = vsel %vm251_vm1, %v387_v49, -inf }
 0x22d   : > { %392 = vmax.xlane.f32.xlu2 %v391_v50 }
 0x22e   : > { %v313_v51 = vpop.f32.mrf.mxu2 }
 0x22f   : > { %v317_v52 = vsel %vm251_vm1, %v313_v51, -inf }
 0x230   : > { %318 = vmax.xlane.f32.xlu0 %v317_v52 }
 0x233   : > { %v389_v53 = vpop.f32.mrf.mxu1 }
 0x236   : > { %v315_v54 = vpop.f32.mrf.mxu2 }
 0x245   : > { %332 = vrot.lane.b32.xlu2 %v331_v5, %s826_s11 }
 0x2a0   : > { %v393_v55 = vpop.xlane.xlu2 %392 }
 0x2a1   : > { %v394_v56 = vsub.f32 %v387_v49, %v393_v55 }
 0x2a3   : > { %v395_v58 = vmul.f32 1.442695, %v394_v56  ;;  %v319_v59 = vpop.xlane.xlu0 %318 }
 0x2a4   : > { %v320_v60 = vsub.f32 %v313_v51, %v319_v59 }
 0x2a5   : > { %748 = vpow2.f32 %v395_v58 }
 0x2a6   : > { %v321_v62 = vmul.f32 1.442695, %v320_v60 }
 0x2a8   : > { %750 = vpow2.f32 %v321_v62  ;;  %v333_v15 = vpop.permute.xlu2 %332 }
 0x2a9   : > { %752 = vpow2.f32 %v469_v63  ;;  %v338_v16 = vsel %vm267_vm2, %v333_v15, 0 }
 0x2aa   : > { %347 = vmatpush.bf16.msra.mxu3 %v338_v16 }
 0x2ab   : > { %v749_v0 = vpop.eup %748 }
 0x2ac   : > { %v397_v2 = vsel %vm251_vm1, %v749_v0, 0.0 }
 0x2ad   : > { %398 = vadd.xlane.f32.xlu1 %v397_v2 }
 0x2ae   : > { %v751_v4 = vpop.eup %750 }
 0x2af   : > { %v323_v6 = vsel %vm251_vm1, %v751_v4, 0.0  ;;  %v753_v7 = vpop.eup %752 }
 0x2b0   : > { %324 = vadd.xlane.f32.xlu0 %v323_v6  ;;  %v471_v8 = vsel %vm251_vm1, %v753_v7, 0.0 }
 0x2b8   : > { %472 = vadd.xlane.f32.xlu0 %v471_v8 }
 0x2c6   : > { %406 = vrot.lane.b32.xlu1 %v405_v12, %s824_s9  ;;  %s212_s9 = sand.u32 1, %s814_s16  }
 0x2c7   : > { %s662_s11 = sshll.u32 %s212_s9, 3  ;;  %s560_s27 = scalar_lea.sflag [#allocation4], %s212_s9 }
 0x2cc   : > { %480 = vrot.lane.b32.xlu0 %v479_v14, %s825_s10  ;;  %s692_s10 = sshll.u32 %s876_s19, 3 }
 0x2cd   : > { %s570_s14 = scalar_lea.hbm %s1013_s4, %s692_s10 }
 0x320   : > { %v399_v20 = vpop.xlane.xlu1 %398 }
 0x323   : > { %v325_v17 = vpop.xlane.xlu0 %324 }
 0x324   : > { %754 = vrcp.f32 %v325_v17 }
 0x325   : > { %756 = vrcp.f32 %v399_v20 }
 0x32a   : > { %v755_v18 = vpop.eup %754 }
 0x32b   : > { %v327_v19 = vmul.f32 %v755_v18, %v751_v4  ;;  %v473_v22 = vpop.xlane.xlu0 %472  ;;  %v757_v23 = vpop.eup %756 }
 0x32c   : > { %758 = vrcp.f32 %v473_v22  ;;  %v401_v25 = vmul.f32 %v757_v23, %v749_v0 }
 0x32d   : > { %v328_v21 = vpack.c.bf16 %v327_v19, %v327_v19 }
 0x32e   : > { %v402_v29 = vpack.c.bf16 %v401_v25, %v401_v25 }
 0x32f   : > { %669 = vmatmul.msk.bf16.vlgmr.msra.gmra.mxu3 %vm251_vm1, %v328_v21 }
 0x332   : > { %v759_v27 = vpop.eup %758 }
 0x333   : > { %v475_v28 = vmul.f32 %v759_v27, %v753_v7 }
 0x335   : > { %v476_v32 = vpack.c.bf16 %v475_v28, %v475_v28 }
 0x338   : > { %v407_v24 = vpop.permute.xlu1 %406 }
 0x339   : > { %v412_v26 = vsel %vm267_vm2, %v407_v24, 0 }
 0x33a   : > { %421 = vmatpush.bf16.msrb.mxu3 %v412_v26 }
 0x33e   : > { %v481_v30 = vpop.permute.xlu0 %480 }
 0x33f   : > { %671 = vmatmul.msk.bf16.vlgmr.msrb.gmra.mxu3 %vm251_vm1, %v402_v29  ;;  %v486_v31 = vsel %vm267_vm2, %v481_v30, 0 }
 0x340   : > { %495 = vmatpush.bf16.msrb.mxu2 %v486_v31 }
 0x343   : > { %673 = vmatmul.msk.bf16.vlgmr.msrb.gmra.mxu2 %vm251_vm1, %v476_v32 }
 0x3b2   : > { %v349_v33 = vpop.f32.mrf.mxu3 }
 0x3b3   : > { %354 = vrot.lane.b32.xlu2 %v349_v33, %s827_s20  ;;  %s214_s20 = scalar_lea.vmem [#allocation3], %s662_s11 }
 0x3ba   : > { %v351_v34 = vpop.f32.mrf.mxu3 }
 0x3c2   : > { %v423_v35 = vpop.f32.mrf.mxu3 }
 0x3c3   : > { %428 = vrot.lane.b32.xlu2 %v423_v35, %s828_s22  ;;  %s572_s22 = sshll.u32 %s214_s20, 4  ;;  %s573_s22 = int_to_ptr.vmem [resolvable:$true] %s572_s22 }
 0x3c6   : > { %v497_v36 = vpop.f32.mrf.mxu2 }
 0x3c7   : > { %502 = vrot.lane.b32.xlu0 %v497_v36, %s829_s23  ;;  %s574_s23 = sshll.u32 %s570_s14, 4  ;;  %s575_s23 = int_to_ptr.hbm [resolvable:$true] %s574_s23 }
 0x3c8   : > { %s774_s28 = sshra.s32 %s575_s23, 4  ;;  %s775_s28 = int_to_ptr.hbm [resolvable:$true] %s774_s28 }
 0x3c9   : > { %s776_s29 = scalar_lea.hbm %s775_s28, 8  ;;  %p781_p0 = scmp.lt.s32.totalorder %s775_s28, %s1013_s4 }
 0x3ca   : > { %v425_v37 = vpop.f32.mrf.mxu3  ;;  %p777_p11 = scmp.ne.s32.totalorder %s775_s28, %s776_s29  ;;  %p782_p1 = scmp.lt.s32.totalorder %s780_s5, %s776_s29 }
 0x3cc   : > { %p778_p12 = pnand %p777_p11, %p893_p5  ;;  %p783_p2 = por %p782_p1, %p781_p0 }
 0x3ce   : > { %v499_v38 = vpop.f32.mrf.mxu2  ;;  %p779_p13 = pneg %p778_p12 }
 0x3d0   : > { %p784_p3 = pnand %p783_p2, %p779_p13 }
 0x40d   : > { %v355_v41 = vpop.permute.xlu2 %354 }
 0x40e   : > { %358 = vst.msk [vmem:[#allocation2] sm:$0xff] %vm357_vm3, %v355_v41 }
 0x41d   : > { %v429_v44 = vpop.permute.xlu2 %428 }
 0x41e   : > { %432 = vst.msk [vmem:[#allocation2] sm:$0xff] %vm431_vm4, %v429_v44 }
 0x439   : > { %v503_v45 = vpop.permute.xlu0 %502 }
 0x43a   : > { %506 = vst.msk [vmem:[#allocation2] sm:$0xff] %vm505_vm5, %v503_v45 }
 0x441   : > { %v507_v46 = vld [vmem:[#allocation2] sm:$0xff] }
 0x442   : > { %v508_v47 = vpack.c.bf16 %v507_v46, %v507_v46 }
 0x444   : > { %690 = vmatmul.msk.bf16.vlgmr.msra.gmra.mxu1 %vm541_vm6, %v508_v47 }
 0x4c1   : > { %v554_v48 = vpop.f32.mrf.mxu1 }
 0x4c2   : > { %558 = vst.msk [vmem:[%s214_s20] sm:$0xff] %vm541_vm6, %v554_v48 }
 0x4c3   : > { %787 = shalt.err (!%p784_p3)
}
 0x4c4   : > { %699 = dma.vmem_to_hbm [thread:$0]  (%p893_p5), %s573_s22, 128, %s575_s23, %s560_s27  }
 0x4c9   : > { %v556_v49 = vpop.f32.mrf.mxu1 }
 0x4ca PF: > { %p705_p4 = scmp.ge.s32.totalorder %s822_s18, 2  ;;  %s586_s8 = sand.u32 1, %s810_s15  }
 0x4cb   : > { %s587_s9 = scalar_lea.sflag [#allocation4], %s586_s8 }
 0x4cc   : > { %p702_p7 = pnand %p705_p4, %p897_p6 }
 0x4ce   : > { %p703_p8 = pneg %p702_p7 }
 0x4d0   : > { %805 = dma.done.wait (%p703_p8), %s587_s9, 128  }
 0x4d1   : > { %807 = vsyncadd (%p703_p8), %s587_s9, 4294967168  ;;  %p14_p9 = scmp.ge.s32.totalorder %s880_s21, 4   ;;  %s1016_s15 = smov %s814_s16 }
 0x4d2   : > { %s1017_s16 = smov %s818_s17  ;;  %s1018_s17 = smov %s891_s24 }
 0x4d3   : > { %s1019_s18 = smov %s880_s21  ;;  %16 = sbr.rel (!%p14_p9) target bundleno = 3 (0x3), region = 77 }
 0x4d8   :  { %593 = vsyncpa [#allocation4], 1 }
 0x4d9   :  { %595 = vsyncpa [#allocation4 + $0x1], 1 }

</bundles_post_ra>
